<compile_context>
chip_gen: v7x
topology: tpu7x:2x2x1
jax: 0.10.0
libtpu: 0.0.40
codegen_flags: <defaults>
</compile_context>

<pallas_src>
import jax
import jax.numpy as jnp
from jax import lax
from jax.experimental import pallas as pl
from jax.experimental.pallas import tpu as pltpu


LANE = 128        # TPU lane width
SLAB = 8          # sublane height; i-rows handled per inner step
TILE_I = 32       # output rows per grid step (multiple of SLAB; small => more grid steps)
TILE_J = 128      # output cols per grid step (lane-dense stores; lane-granular minimum)


def _round_up(x, m):
    return ((x + m - 1) // m) * m


# --------------------------------------------------------------------------------------
# Pallas kernel 1: per-token fc_1 projections (computed once, not per (i, j) tile)
# --------------------------------------------------------------------------------------
def projection_kernel(v_ref, w_ref, b_ref, hm_ref):
    """hm = v @ [W1_head^T | W1_mod^T] + [b1 | 0]."""
    hm_ref[...] = (
        jnp.dot(v_ref[...], w_ref[...], preferred_element_type=jnp.float32)
        + b_ref[...]
    )


# --------------------------------------------------------------------------------------
# Pallas kernel 2: gridded pairwise MLP scorer
# --------------------------------------------------------------------------------------
def _make_pairwise_kernel(seq_len):
    """Kernel closure over the true (static) sentence length."""

    def pairwise_tile_kernel(ht_ref, mpan_ref, w2_ref, b2_ref, out_ref):
        """One (TILE_I, TILE_J) tile of
             scores[i, j] = w2 · tanh(h_pre[j, :] + m_pre[i, :]) + b2

        ht_ref   : (F_pad, TILE_J)          head pre-acts, f on sublanes, j on lanes
        mpan_ref : (TILE_I//8, F_pad, 8)    modifier pre-acts packed in 8-row panels
        w2_ref   : (1, F_pad)               fc_2 weights as a row vector
        b2_ref   : (1, 1) in SMEM           fc_2 bias
        out_ref  : (TILE_I, TILE_J)
        """
        i = pl.program_id(0)
        w2 = w2_ref[...]                       # (1, F_pad): tiny, stays resident
        b2 = b2_ref[0, 0]                      # scalar read from SMEM

        # Only iterate over slabs that contain real (unpadded) rows of this i-tile.
        rows_valid = jnp.minimum(seq_len - i * TILE_I, TILE_I)
        n_slabs = (rows_valid + (SLAB - 1)) // SLAB

        def slab_body(s, carry):
            base = pl.multiple_of(s * SLAB, SLAB)
            rows = []
            for a in range(SLAB):                       # static unroll over the slab
                # (F_pad, 1) modifier column for row base+a (re-read, not hoisted).
                m_col = mpan_ref[s, :, a:a + 1]
                # ht re-read from VMEM per row (vld slots have headroom; EUP binds).
                # Unit-lane broadcast add + tanh (EUP).
                act = jnp.tanh(ht_ref[...] + m_col)     # (F_pad, TILE_J)
                # fc_2 weighted reduce on the MXU: (1,F) x (F,TILE_J) -> (1,TILE_J).
                rows.append(jnp.dot(w2, act, preferred_element_type=jnp.float32))
            # One unmasked (8, TILE_J) store per slab.
            out_ref[pl.ds(base, SLAB), :] = jnp.concatenate(rows, axis=0) + b2
            return carry

        lax.fori_loop(0, n_slabs, slab_body, 0)

    return pairwise_tile_kernel


def pairwise_scores_pallas(v, W1, b1, W2, b2, *, compute_dtype=jnp.float32):
    """scores_mat = fc_2(tanh(fc_1(cat(heads, modifiers, 2)))).squeeze()  (PyTorch)."""
    L, D = v.shape
    F = W1.shape[0]
    D_pad = _round_up(D, LANE)                 # 250 -> 256
    F_pad = _round_up(F, LANE)                 # 100 -> 128
    L_pad_i = _round_up(L, TILE_I)             # i axis pads only to TILE_I=32
    L_pad_j = _round_up(L, TILE_J)             # j axis pads to lane-dense 128
    L_pad = max(L_pad_i, L_pad_j)
    f32 = jnp.float32

    # Zero-padded, lane-aligned operands (padded f lanes contribute exactly 0).
    v_pad = jnp.zeros((L_pad, D_pad), f32).at[:L, :D].set(v.astype(f32))
    w_cat = (jnp.zeros((D_pad, 2 * F_pad), f32)
             .at[:D, :F].set(W1[:, :D].T.astype(f32))                  # head half
             .at[:D, F_pad:F_pad + F].set(W1[:, D:].T.astype(f32)))    # modifier half
    b_cat = jnp.zeros((1, 2 * F_pad), f32).at[0, :F].set(b1.astype(f32))
    w2_row = jnp.zeros((1, F_pad), f32).at[0, :F].set(W2.reshape(-1).astype(f32))
    b2_smem = jnp.asarray(b2, f32).reshape(1, 1)

    # ---- stage 1: fc_1 projections, once per sentence (small single-block kernel).
    vmem = pl.BlockSpec(memory_space=pltpu.MemorySpace.VMEM)
    hm = pl.pallas_call(
        projection_kernel,
        out_shape=jax.ShapeDtypeStruct((L_pad, 2 * F_pad), f32),
        in_specs=[vmem, vmem, vmem],
        out_specs=vmem,
    )(v_pad, w_cat, b_cat)

    # Layout plumbing (plain XLA, tiny): head part transposed so f sits on sublanes /
    # j on lanes; modifier part packed into 8-row panels so the tile kernel needs no
    # in-kernel transposes or dynamic lane slicing.
    h_t = hm[:L_pad_j, :F_pad].T.astype(compute_dtype)                 # (F_pad, L_pad_j)
    m_panels = (hm[:L_pad_i, F_pad:]
                .reshape(L_pad_i // SLAB, SLAB, F_pad)
                .transpose(0, 2, 1)
                .astype(compute_dtype))                                # (L_pad_i/8, F_pad, 8)
    w2_c = w2_row.astype(compute_dtype)

    # ---- stage 2: gridded pairwise scorer over (i, j) output tiles.
    grid = (L_pad_i // TILE_I, L_pad_j // TILE_J)
    scores_pad = pl.pallas_call(
        _make_pairwise_kernel(L),
        out_shape=jax.ShapeDtypeStruct((L_pad_i, L_pad_j), f32),
        grid_spec=pltpu.PrefetchScalarGridSpec(
            num_scalar_prefetch=0,
            grid=grid,
            in_specs=[
                pl.BlockSpec((F_pad, TILE_J), lambda i, j: (0, j)),               # heads
                pl.BlockSpec((TILE_I // SLAB, F_pad, SLAB), lambda i, j: (i, 0, 0)),  # modifiers
                pl.BlockSpec((1, F_pad), lambda i, j: (0, 0)),                    # fc_2 weight
                pl.BlockSpec((1, 1), lambda i, j: (0, 0),
                             memory_space=pltpu.MemorySpace.SMEM),                # fc_2 bias
            ],
            out_specs=pl.BlockSpec((TILE_I, TILE_J), lambda i, j: (i, j)),
        ),
        compiler_params=pltpu.CompilerParams(
            dimension_semantics=("parallel", "parallel"),
            vmem_limit_bytes=32 * 1024 * 1024,
        ),
    )(h_t, m_panels, w2_c, b2_smem)

    # Rows/cols >= L of scores_pad are garbage (or unwritten); slice before use.
    return scores_pad[:L, :L]


# --------------------------------------------------------------------------------------
# EncoderBiLSTM (plain JAX glue, PyTorch nn.LSTM semantics, gate order i,f,g,o)
# --------------------------------------------------------------------------------------
def lstm_scan(x_seq, W_ih, W_hh, b_ih, b_hh, H):
    def step(carry, x_t):
        h, c = carry
        gates = x_t @ W_ih.T + h @ W_hh.T + b_ih + b_hh
        i = jax.nn.sigmoid(gates[:H])
        f = jax.nn.sigmoid(gates[H:2 * H])
        g = jnp.tanh(gates[2 * H:3 * H])
        o = jax.nn.sigmoid(gates[3 * H:4 * H])
        c_new = f * c + i * g
        h_new = o * jnp.tanh(c_new)
        return (h_new, c_new), h_new

    h0 = jnp.zeros((H,), jnp.float32)
    c0 = jnp.zeros((H,), jnp.float32)
    _, hs = lax.scan(step, (h0, c0), x_seq)
    return hs  # (T, H)


def encoder_forward(words_embeddings, poss_indices, pos_table, lstm_params, H):
    pos_emb = pos_table[poss_indices]                                  # (L, pos_dim)
    x = jnp.concatenate([words_embeddings, pos_emb], axis=1)           # (L, word+pos)
    for (fwd, bwd) in lstm_params:
        h_fwd = lstm_scan(x, *fwd, H)
        h_bwd = lstm_scan(x[::-1], *bwd, H)[::-1]
        x = jnp.concatenate([h_fwd, h_bwd], axis=1)                    # (L, 2H)
    return x


# --------------------------------------------------------------------------------------
# Deterministic parameter construction (mirrors module __init__ shapes)
# --------------------------------------------------------------------------------------
def init_params(key, word_dim, pos_vocab, pos_dim, H_lstm, F_fc, num_layers):
    keys = iter(jax.random.split(key, 64))

    def unif(k, shape, bound):
        return jax.random.uniform(k, shape, jnp.float32, -bound, bound)

    pos_table = jax.random.normal(next(keys), (pos_vocab, pos_dim), jnp.float32)

    k_lstm = 1.0 / jnp.sqrt(H_lstm)
    lstm_params = []
    for layer in range(num_layers):
        in_dim = word_dim + pos_dim if layer == 0 else 2 * H_lstm
        dirs = []
        for _ in range(2):  # forward, backward
            W_ih = unif(next(keys), (4 * H_lstm, in_dim), k_lstm)
            W_hh = unif(next(keys), (4 * H_lstm, H_lstm), k_lstm)
            b_ih = unif(next(keys), (4 * H_lstm,), k_lstm)
            b_hh = unif(next(keys), (4 * H_lstm,), k_lstm)
            dirs.append((W_ih, W_hh, b_ih, b_hh))
        lstm_params.append(tuple(dirs))

    D = 2 * H_lstm  # encoder output feature dim
    k1 = 1.0 / jnp.sqrt(2 * D)          # fc_1 fan_in = hidden_dim_lstm*2*2
    W1 = unif(next(keys), (F_fc, 2 * D), k1)
    b1 = unif(next(keys), (F_fc,), k1)
    k2 = 1.0 / jnp.sqrt(F_fc)
    W2 = unif(next(keys), (1, F_fc), k2)
    b2 = unif(next(keys), (1,), k2)

    return pos_table, lstm_params, (W1, b1, W2, b2)


# --------------------------------------------------------------------------------------
# Pure-JAX reference of the PyTorch forward (for validation only)
# --------------------------------------------------------------------------------------
def ref_scores(v, W1, b1, W2, b2):
    L = v.shape[0]
    heads = jnp.tile(v, (L, 1)).reshape(L, L, -1)       # heads[i, j] = v[j]
    modifiers = jnp.transpose(heads, (1, 0, 2))         # modifiers[i, j] = v[i]
    x = jnp.concatenate([heads, modifiers], axis=2)
    h = jnp.tanh(x @ W1.T + b1)
    return (h @ W2.T + b2)[..., 0]


# --------------------------------------------------------------------------------------
if __name__ == "__main__":
    WORD_DIM = 32        # word embedding dim (comes from sentences in the torch code)
    POS_VOCAB = 17
    POS_DIM = 25         # module default
    H_LSTM = 125         # module default
    F_FC = 100           # module default
    NUM_LAYERS = 2       # module default

    key = jax.random.PRNGKey(0)
    k_par, k_small, k_big = jax.random.split(key, 3)

    pos_table, lstm_params, (W1, b1, W2, b2) = init_params(
        k_par, WORD_DIM, POS_VOCAB, POS_DIM, H_LSTM, F_FC, NUM_LAYERS)

    def forward(words_embeddings, poss_indices):
        v = encoder_forward(words_embeddings, poss_indices, pos_table, lstm_params,
                            H_LSTM)
        return v, pairwise_scores_pallas(v, W1, b1, W2, b2)

    # ---- sentence 1: small (L=8) -> single-tile, single-slab path --------------------
    L1 = 8
    k_in1, k_pos1 = jax.random.split(k_small)
    we1 = jax.random.normal(k_in1, (L1, WORD_DIM), jnp.float32)
    pi1 = jax.random.randint(k_pos1, (L1,), 0, POS_VOCAB)
    v1, scores1 = forward(we1, pi1)
    scores1 = jax.block_until_ready(scores1)
    ref1 = ref_scores(v1, W1, b1, W2, b2)
    assert scores1.shape == (L1, L1)
    assert jnp.allclose(scores1, ref1, atol=5e-4, rtol=5e-4), "L=8 kernel mismatch"

    # ---- sentence 2: longer (L=150) -> 5x2 tile grid, partial last i-tile -------------
    L2 = 150
    k_in2, k_pos2 = jax.random.split(k_big)
    we2 = jax.random.normal(k_in2, (L2, WORD_DIM), jnp.float32)
    pi2 = jax.random.randint(k_pos2, (L2,), 0, POS_VOCAB)
    v2, scores2 = forward(we2, pi2)
    scores2 = jax.block_until_ready(scores2)
    ref2 = ref_scores(v2, W1, b1, W2, b2)
    assert scores2.shape == (L2, L2)
    assert jnp.allclose(scores2, ref2, atol=5e-4, rtol=5e-4), "L=150 kernel mismatch"

    print("KERNEL_OK")
</pallas_src>

<mosaic_0001>
module attributes {stable_mosaic.version = 11 : i64} {
  func.func @projection_kernel(%arg0: memref<128x256xf32, #tpu.memory_space<vmem>>, %arg1: memref<256x256xf32, #tpu.memory_space<vmem>>, %arg2: memref<1x256xf32, #tpu.memory_space<vmem>>, %arg3: memref<128x256xf32, #tpu.memory_space<vmem>>) attributes {dimension_semantics = [], scalar_prefetch = 0 : i64, scratch_operands = 0 : i64, tpu.core_type = #tpu.core_type<tc>} {
    %c0 = arith.constant 0 : index
    %c0_0 = arith.constant 0 : index
    %0 = vector.load %arg0[%c0, %c0_0] : memref<128x256xf32, #tpu.memory_space<vmem>>, vector<128x256xf32>
    %c0_1 = arith.constant 0 : index
    %c0_2 = arith.constant 0 : index
    %1 = vector.load %arg1[%c0_1, %c0_2] : memref<256x256xf32, #tpu.memory_space<vmem>>, vector<256x256xf32>
    %cst = arith.constant dense<0.000000e+00> : vector<128x256xf32>
    %2 = tpu.matmul %0, %1, %cst {dimension_numbers = #tpu.dot_dimension_numbers<[1], [0], [0], [1], [0, 0, 1, 1], [], []>} : vector<128x256xf32>, vector<256x256xf32>, vector<128x256xf32> -> vector<128x256xf32>
    %c0_3 = arith.constant 0 : index
    %c0_4 = arith.constant 0 : index
    %3 = vector.load %arg2[%c0_3, %c0_4] : memref<1x256xf32, #tpu.memory_space<vmem>>, vector<1x256xf32>
    %4 = vector.broadcast %3 : vector<1x256xf32> to vector<128x256xf32>
    %5 = arith.addf %2, %4 : vector<128x256xf32>
    %c0_5 = arith.constant 0 : index
    %c0_6 = arith.constant 0 : index
    %6 = vector.load %arg3[%c0_5, %c0_6] : memref<128x256xf32, #tpu.memory_space<vmem>>, vector<128x256xf32>
    tpu.vector_store %arg3[%c0_5, %c0_6], %5 {strides = array<i32>} : memref<128x256xf32, #tpu.memory_space<vmem>>, vector<128x256xf32>,
    return
  }
}

</mosaic_0001>

<bundles_post_ra>
// kernel: tpu_custom_call.1
= control target key start
LH: loop header
LB: loop body
LE: loop exit
PB: predicated region body
PF: predicated region fallthrough
CT: control target
= control target key end

     0   :  { %8 = vsyncpa [#allocation3], 0  ;;  %s644_s0 = inlined_call_operand.hbm [shape: f32[128,256], index: 0, kind: input, shape index: {}]   ;;  %s645_s1 = inlined_call_operand.hbm [shape: f32[256,256], index: 1, kind: input, shape index: {}]   ;;  %s646_s2 = inlined_call_operand.vmem [shape: f32[1,256], index: 2, kind: input, shape index: {}]   ;;  %s647_s3 = inlined_call_operand.hbm [shape: f32[128,256], index: 3, kind: output, shape index: {}]  }
   0x1   :  { %9 = vsyncpa [#allocation6], 0 }
   0x2   :  { %10 = vsyncpa [#allocation4], 0  ;;  %s535_s12 = smov [#allocation2]   ;;  %s463_s16 = scalar_lea.hbm %s644_s0, 4096 }
   0x3   :  { %s16_s13 = sshll.u32 %s535_s12, 4  ;;  %p464_p0 = scmp.ne.s32.totalorder %s644_s0, %s463_s16  ;;  %s17_s13 = int_to_ptr.vmem [resolvable:$true] %s16_s13 }
   0x4   :  { %p467_p1 = scmp.lt.u32.totalorder %s463_s16, %s644_s0 }
   0x6   :  { %p469_p2 = pnand %p467_p1, %p464_p0 }
   0x8   :  { %472 = shalt.err (!%p469_p2)
}
   0x9   :  { %s473_s21 = scalar_lea.vmem %s17_s13, 4096  ;;  %p478_p4 = scmp.lt.s32.totalorder %s17_s13, %s17_s13 }
   0xa   :  { %p474_p3 = scmp.ne.s32.totalorder %s17_s13, %s473_s21  ;;  %p479_p5 = scmp.lt.s32.totalorder %s473_s21, %s473_s21 }
   0xc   :  { %p480_p6 = por %p479_p5, %p478_p4 }
   0xe   :  { %p481_p7 = pnand %p480_p6, %p474_p3 }
  0x10   :  { %484 = shalt.err (!%p481_p7)
}
  0x11   :  { %s536_s22 = smov 256   ;;  %s537_s23 = smov 16  }
  0x12   :  { %22 = dma.hbm_to_vmem [thread:$0]  %s644_s0, 4096, %s17_s13, [#allocation3], %s536_s22, %s536_s22, %s537_s23  }
  0x13   :  { %s538_s26 = smov [#allocation5]   ;;  %s485_s30 = scalar_lea.hbm %s645_s1, 8192 }
  0x14   :  { %s28_s27 = sshll.u32 %s538_s26, 4  ;;  %p486_p8 = scmp.ne.s32.totalorder %s645_s1, %s485_s30  ;;  %s29_s27 = int_to_ptr.vmem [resolvable:$true] %s28_s27 }
  0x15   :  { %p489_p9 = scmp.lt.u32.totalorder %s485_s30, %s645_s1 }
  0x17   :  { %p491_p10 = pnand %p489_p9, %p486_p8 }
  0x19   :  { %494 = shalt.err (!%p491_p10)
}
  0x1a   :  { %s495_s8 = scalar_lea.vmem %s29_s27, 8192  ;;  %p500_p12 = scmp.lt.s32.totalorder %s29_s27, %s29_s27 }
  0x1b   :  { %p496_p11 = scmp.ne.s32.totalorder %s29_s27, %s495_s8  ;;  %p501_p13 = scmp.lt.s32.totalorder %s495_s8, %s495_s8 }
  0x1d   :  { %p502_p0 = por %p501_p13, %p500_p12 }
  0x1f   :  { %p503_p1 = pnand %p502_p0, %p496_p11 }
  0x21   :  { %506 = shalt.err (!%p503_p1)
}
  0x22   :  { %34 = dma.hbm_to_vmem [thread:$0]  %s645_s1, 8192, %s29_s27, [#allocation6], %s536_s22, %s536_s22, %s537_s23  }
  0x23   :  { %529 = dma.done.wait [#allocation3], 4096  }
  0x24   :  { %530 = vsyncadd [#allocation3], 4294963200 }
  0x25   :  { %531 = dma.done.wait [#allocation6], 8192  }
  0x26   :  { %532 = vsyncadd [#allocation6], 4294959104  ;;  %v76_v0 = vld [vmem:[#allocation5 + $0x8] sm:$0xff]  ;;  %v78_v1 = vld [vmem:[#allocation5 + $0x18] sm:$0xff] }
  0x27   :  { %v75_v2 = vld [vmem:[#allocation5] sm:$0xff]  ;;  %v362_v3 = vpack.c.bf16 %v78_v1, %v76_v0  ;;  %v77_v4 = vld [vmem:[#allocation5 + $0x10] sm:$0xff]  ;;  %v80_v5 = vld [vmem:[#allocation5 + $0x28] sm:$0xff] }
  0x28   :  { %v82_v6 = vld [vmem:[#allocation5 + $0x38] sm:$0xff]  ;;  %v364_v7 = vpack.c.bf16 %v77_v4, %v75_v2  ;;  %v79_v9 = vld [vmem:[#allocation5 + $0x20] sm:$0xff]  ;;  %v81_v10 = vld [vmem:[#allocation5 + $0x30] sm:$0xff] }
  0x29   :  { %v366_v8 = vpack.c.bf16 %v82_v6, %v80_v5  ;;  %v84_v11 = vld [vmem:[#allocation5 + $0x48] sm:$0xff]  ;;  %363 = vmatprep.subr.bf16.mxu0 %v362_v3  ;;  %426 = vmatprep.subr.bf16.mxu1 %v362_v3  ;;  %v86_v12 = vld [vmem:[#allocation5 + $0x58] sm:$0xff]  ;;  %v368_v13 = vpack.c.bf16 %v81_v10, %v79_v9  ;;  %v83_v15 = vld [vmem:[#allocation5 + $0x40] sm:$0xff] }
  0x2a   :  { %365 = vmatpush1.bf16.msra.mxu0 %v364_v7  ;;  %442 = vmatpush1.bf16.msra.mxu1 %v364_v7  ;;  %v370_v14 = vpack.c.bf16 %v86_v12, %v84_v11  ;;  %v85_v16 = vld [vmem:[#allocation5 + $0x50] sm:$0xff]  ;;  %v88_v17 = vld [vmem:[#allocation5 + $0x68] sm:$0xff]  ;;  %v90_v18 = vld [vmem:[#allocation5 + $0x78] sm:$0xff] }
  0x2b   :  { %367 = vmatprep.subr.bf16.mxu0 %v366_v8  ;;  %427 = vmatprep.subr.bf16.mxu1 %v366_v8  ;;  %v372_v19 = vpack.c.bf16 %v85_v16, %v83_v15  ;;  %v374_v20 = vpack.c.bf16 %v90_v18, %v88_v17  ;;  %v87_v21 = vld [vmem:[#allocation5 + $0x60] sm:$0xff]  ;;  %v89_v22 = vld [vmem:[#allocation5 + $0x70] sm:$0xff]  ;;  %v92_v23 = vld [vmem:[#allocation5 + $0x88] sm:$0xff] }
  0x2c   :  { %v94_v24 = vld [vmem:[#allocation5 + $0x98] sm:$0xff]  ;;  %v376_v25 = vpack.c.bf16 %v89_v22, %v87_v21  ;;  %v91_v27 = vld [vmem:[#allocation5 + $0x80] sm:$0xff]  ;;  %v93_v28 = vld [vmem:[#allocation5 + $0x90] sm:$0xff] }
  0x2d   :  { %v378_v26 = vpack.c.bf16 %v94_v24, %v92_v23  ;;  %v96_v29 = vld [vmem:[#allocation5 + $0xa8] sm:$0xff]  ;;  %v98_v30 = vld [vmem:[#allocation5 + $0xb8] sm:$0xff]  ;;  %v380_v31 = vpack.c.bf16 %v93_v28, %v91_v27  ;;  %v95_v33 = vld [vmem:[#allocation5 + $0xa0] sm:$0xff] }
  0x2e   :  { %369 = vmatpush1.bf16.msra.mxu0 %v368_v13  ;;  %443 = vmatpush1.bf16.msra.mxu1 %v368_v13  ;;  %v382_v32 = vpack.c.bf16 %v98_v30, %v96_v29  ;;  %v97_v34 = vld [vmem:[#allocation5 + $0xb0] sm:$0xff]  ;;  %v100_v35 = vld [vmem:[#allocation5 + $0xc8] sm:$0xff]  ;;  %v102_v36 = vld [vmem:[#allocation5 + $0xd8] sm:$0xff] }
  0x2f   :  { %371 = vmatprep.subr.bf16.mxu0 %v370_v14  ;;  %428 = vmatprep.subr.bf16.mxu1 %v370_v14  ;;  %v384_v37 = vpack.c.bf16 %v97_v34, %v95_v33  ;;  %v99_v38 = vld [vmem:[#allocation5 + $0xc0] sm:$0xff]  ;;  %v386_v39 = vpack.c.bf16 %v102_v36, %v100_v35  ;;  %v101_v40 = vld [vmem:[#allocation5 + $0xd0] sm:$0xff]  ;;  %v44_v41 = vld [vmem:[#allocation2 + $0x8] sm:$0xff] }
  0x30   :  { %v60_v42 = vld [vmem:[#allocation2 + $0x88] sm:$0xff]  ;;  %v106_v44 = vld [vmem:[#allocation5 + $0xf8] sm:$0xff]  ;;  %215 = vmatprep.mubr.f32.mxu0 %v44_v41  ;;  %v388_v45 = vpack.c.bf16 %v101_v40, %v99_v38  ;;  %v103_v47 = vld [vmem:[#allocation5 + $0xe0] sm:$0xff] }
  0x31   :  { %v104_v43 = vld [vmem:[#allocation5 + $0xe8] sm:$0xff]  ;;  %263 = vmatprep.mubr.f32.mxu1 %v60_v42  ;;  %v105_v48 = vld [vmem:[#allocation5 + $0xf0] sm:$0xff]  ;;  %v110_v50 = vld [vmem:[#allocation5 + $0x118] sm:$0xff] }
  0x32   :  { %373 = vmatpush1.bf16.msra.mxu0 %v372_v19  ;;  %444 = vmatpush1.bf16.msra.mxu1 %v372_v19  ;;  %v390_v46 = vpack.c.bf16 %v106_v44, %v104_v43  ;;  %v108_v49 = vld [vmem:[#allocation5 + $0x108] sm:$0xff]  ;;  %v392_v51 = vpack.c.bf16 %v105_v48, %v103_v47  ;;  %v107_v53 = vld [vmem:[#allocation5 + $0x100] sm:$0xff]  ;;  %v109_v54 = vld [vmem:[#allocation5 + $0x110] sm:$0xff] }
  0x33   :  { %375 = vmatprep.subr.bf16.mxu0 %v374_v20  ;;  %429 = vmatprep.subr.bf16.mxu1 %v374_v20  ;;  %v394_v52 = vpack.c.bf16 %v110_v50, %v108_v49  ;;  %v112_v55 = vld [vmem:[#allocation5 + $0x128] sm:$0xff]  ;;  %v114_v56 = vld [vmem:[#allocation5 + $0x138] sm:$0xff]  ;;  %v396_v57 = vpack.c.bf16 %v109_v54, %v107_v53  ;;  %v111_v59 = vld [vmem:[#allocation5 + $0x120] sm:$0xff] }
  0x34   :  { %v398_v58 = vpack.c.bf16 %v114_v56, %v112_v55  ;;  %v113_v60 = vld [vmem:[#allocation5 + $0x130] sm:$0xff]  ;;  %v116_v61 = vld [vmem:[#allocation5 + $0x148] sm:$0xff]  ;;  %v118_v62 = vld [vmem:[#allocation5 + $0x158] sm:$0xff] }
  0x35   :  { %v400_v63 = vpack.c.bf16 %v113_v60, %v111_v59  ;;  %v402_v0 = vpack.c.bf16 %v118_v62, %v116_v61  ;;  %v115_v1 = vld [vmem:[#allocation5 + $0x140] sm:$0xff]  ;;  %v117_v2 = vld [vmem:[#allocation5 + $0x150] sm:$0xff]  ;;  %v120_v3 = vld [vmem:[#allocation5 + $0x168] sm:$0xff] }
  0x36   :  { %377 = vmatpush1.bf16.msra.mxu0 %v376_v25  ;;  %445 = vmatpush1.bf16.msra.mxu1 %v376_v25  ;;  %v122_v4 = vld [vmem:[#allocation5 + $0x178] sm:$0xff]  ;;  %v404_v5 = vpack.c.bf16 %v117_v2, %v115_v1  ;;  %v119_v7 = vld [vmem:[#allocation5 + $0x160] sm:$0xff]  ;;  %v121_v8 = vld [vmem:[#allocation5 + $0x170] sm:$0xff] }
  0x37   :  { %379 = vmatprep.subr.bf16.mxu0 %v378_v26  ;;  %430 = vmatprep.subr.bf16.mxu1 %v378_v26  ;;  %v406_v6 = vpack.c.bf16 %v122_v4, %v120_v3  ;;  %v124_v9 = vld [vmem:[#allocation5 + $0x188] sm:$0xff]  ;;  %v126_v10 = vld [vmem:[#allocation5 + $0x198] sm:$0xff]  ;;  %v408_v11 = vpack.c.bf16 %v121_v8, %v119_v7  ;;  %v123_v13 = vld [vmem:[#allocation5 + $0x180] sm:$0xff] }
  0x38   :  { %v410_v12 = vpack.c.bf16 %v126_v10, %v124_v9  ;;  %v125_v14 = vld [vmem:[#allocation5 + $0x190] sm:$0xff]  ;;  %v128_v15 = vld [vmem:[#allocation5 + $0x1a8] sm:$0xff]  ;;  %v130_v16 = vld [vmem:[#allocation5 + $0x1b8] sm:$0xff] }
  0x39   :  { %v412_v17 = vpack.c.bf16 %v125_v14, %v123_v13  ;;  %v414_v18 = vpack.c.bf16 %v130_v16, %v128_v15  ;;  %v127_v19 = vld [vmem:[#allocation5 + $0x1a0] sm:$0xff]  ;;  %v129_v20 = vld [vmem:[#allocation5 + $0x1b0] sm:$0xff]  ;;  %v132_v21 = vld [vmem:[#allocation5 + $0x1c8] sm:$0xff] }
  0x3a   :  { %381 = vmatpush1.bf16.msra.mxu0 %v380_v31  ;;  %446 = vmatpush1.bf16.msra.mxu1 %v380_v31  ;;  %v134_v22 = vld [vmem:[#allocation5 + $0x1d8] sm:$0xff]  ;;  %v416_v23 = vpack.c.bf16 %v129_v20, %v127_v19  ;;  %v131_v25 = vld [vmem:[#allocation5 + $0x1c0] sm:$0xff]  ;;  %v133_v26 = vld [vmem:[#allocation5 + $0x1d0] sm:$0xff] }
  0x3b   :  { %383 = vmatprep.subr.bf16.mxu0 %v382_v32  ;;  %431 = vmatprep.subr.bf16.mxu1 %v382_v32  ;;  %v418_v24 = vpack.c.bf16 %v134_v22, %v132_v21  ;;  %v136_v27 = vld [vmem:[#allocation5 + $0x1e8] sm:$0xff]  ;;  %v138_v28 = vld [vmem:[#allocation5 + $0x1f8] sm:$0xff]  ;;  %v420_v29 = vpack.c.bf16 %v133_v26, %v131_v25  ;;  %v135_v31 = vld [vmem:[#allocation5 + $0x1e0] sm:$0xff] }
  0x3c   :  { %v422_v30 = vpack.c.bf16 %v138_v28, %v136_v27  ;;  %v137_v32 = vld [vmem:[#allocation5 + $0x1f0] sm:$0xff]  ;;  %v43_v34 = vld [vmem:[#allocation2] sm:$0xff]  ;;  %v46_v36 = vld [vmem:[#allocation2 + $0x18] sm:$0xff] }
  0x3d   :  { %v424_v33 = vpack.c.bf16 %v137_v32, %v135_v31  ;;  %v59_v35 = vld [vmem:[#allocation2 + $0x80] sm:$0xff]  ;;  %v45_v38 = vld [vmem:[#allocation2 + $0x10] sm:$0xff]  ;;  %v48_v40 = vld [vmem:[#allocation2 + $0x28] sm:$0xff] }
  0x3e   :  { %385 = vmatpush1.bf16.msra.mxu0 %v384_v37  ;;  %447 = vmatpush1.bf16.msra.mxu1 %v384_v37  ;;  %v62_v37 = vld [vmem:[#allocation2 + $0x98] sm:$0xff]  ;;  %v64_v41 = vld [vmem:[#allocation2 + $0xa8] sm:$0xff]  ;;  %v47_v42 = vld [vmem:[#allocation2 + $0x20] sm:$0xff] }
  0x3f   :  { %387 = vmatprep.subr.bf16.mxu0 %v386_v39  ;;  %432 = vmatprep.subr.bf16.mxu1 %v386_v39  ;;  %v61_v39 = vld [vmem:[#allocation2 + $0x90] sm:$0xff]  ;;  %v63_v43 = vld [vmem:[#allocation2 + $0xa0] sm:$0xff]  ;;  %v50_v44 = vld [vmem:[#allocation2 + $0x38] sm:$0xff] }
  0x40   :  { %v65_v47 = vld [vmem:[#allocation2 + $0xb0] sm:$0xff]  ;;  %v52_v48 = vld [vmem:[#allocation2 + $0x48] sm:$0xff]  ;;  %v51_v50 = vld [vmem:[#allocation2 + $0x40] sm:$0xff] }
  0x41   :  { %v68_v49 = vld [vmem:[#allocation2 + $0xc8] sm:$0xff]  ;;  %v70_v53 = vld [vmem:[#allocation2 + $0xd8] sm:$0xff]  ;;  %v53_v54 = vld [vmem:[#allocation2 + $0x50] sm:$0xff] }
  0x42   :  { %389 = vmatpush1.bf16.msra.mxu0 %v388_v45  ;;  %448 = vmatpush1.bf16.msra.mxu1 %v388_v45  ;;  %v66_v45 = vld [vmem:[#allocation2 + $0xb8] sm:$0xff]  ;;  %v69_v55 = vld [vmem:[#allocation2 + $0xd0] sm:$0xff]  ;;  %v56_v56 = vld [vmem:[#allocation2 + $0x68] sm:$0xff] }
  0x43   :  { %391 = vmatprep.subr.bf16.mxu0 %v390_v46  ;;  %433 = vmatprep.subr.bf16.mxu1 %v390_v46  ;;  %v49_v46 = vld [vmem:[#allocation2 + $0x30] sm:$0xff]  ;;  %v71_v59 = vld [vmem:[#allocation2 + $0xe0] sm:$0xff]  ;;  %v58_v60 = vld [vmem:[#allocation2 + $0x78] sm:$0xff] }
  0x44   :  { %v74_v61 = vld [vmem:[#allocation2 + $0xf8] sm:$0xff]  ;;  %v57_v62 = vld [vmem:[#allocation2 + $0x70] sm:$0xff]  ;;  %v139_v3 = vld [vmem:[%s646_s2] sm:$0x3]  ;;  %s539_s2 = smov [#allocation7]  }
  0x45   :  { %s349_s11 = sshll.u32 %s539_s2, 4  ;;  %s350_s11 = int_to_ptr.vmem [resolvable:$true] %s349_s11 }
  0x46   :  { %393 = vmatpush1.bf16.msra.mxu0 %v392_v51  ;;  %449 = vmatpush1.bf16.msra.mxu1 %v392_v51  ;;  %v67_v51 = vld [vmem:[#allocation2 + $0xc0] sm:$0xff]  ;;  %s507_s12 = scalar_lea.vmem %s350_s11, 4096  ;;  %p512_p3 = scmp.lt.s32.totalorder %s350_s11, %s350_s11 }
  0x47   :  { %395 = vmatprep.subr.bf16.mxu0 %v394_v52  ;;  %434 = vmatprep.subr.bf16.mxu1 %v394_v52  ;;  %v54_v52 = vld [vmem:[#allocation2 + $0x58] sm:$0xff]  ;;  %p508_p2 = scmp.ne.s32.totalorder %s350_s11, %s507_s12  ;;  %p513_p4 = scmp.lt.s32.totalorder %s507_s12, %s507_s12 }
  0x49   :  { %p514_p5 = por %p513_p4, %p512_p3 }
  0x4a   :  { %397 = vmatpush1.bf16.msra.mxu0 %v396_v57  ;;  %450 = vmatpush1.bf16.msra.mxu1 %v396_v57  ;;  %v72_v57 = vld [vmem:[#allocation2 + $0xe8] sm:$0xff] }
  0x4b   :  { %399 = vmatprep.subr.bf16.mxu0 %v398_v58  ;;  %435 = vmatprep.subr.bf16.mxu1 %v398_v58  ;;  %v55_v58 = vld [vmem:[#allocation2 + $0x60] sm:$0xff]  ;;  %p515_p6 = pnand %p514_p5, %p508_p2 }
  0x4e   :  { %401 = vmatpush1.bf16.msra.mxu0 %v400_v63  ;;  %451 = vmatpush1.bf16.msra.mxu1 %v400_v63  ;;  %v73_v63 = vld [vmem:[#allocation2 + $0xf0] sm:$0xff] }
  0x4f   :  { %403 = vmatprep.subr.bf16.mxu0 %v402_v0  ;;  %436 = vmatprep.subr.bf16.mxu1 %v402_v0  ;;  %v141_v0 = vlaneseq }
  0x51   :  { %v142_v1 = vshrl.u32 %v141_v0, 7 }
  0x52   :  { %405 = vmatpush1.bf16.msra.mxu0 %v404_v5  ;;  %452 = vmatpush1.bf16.msra.mxu1 %v404_v5 }
  0x53   :  { %407 = vmatprep.subr.bf16.mxu0 %v406_v6  ;;  %437 = vmatprep.subr.bf16.mxu1 %v406_v6  ;;  %v143_v2 = vsub.s32 0, %v142_v1  ;;  %v147_v4 = vsub.s32 1, %v142_v1 }
  0x55   :  { %v593_v5 = vrot.slane %v139_v3, %v143_v2  ;;  %v595_v6 = vrot.slane %v139_v3, %v147_v4 }
  0x56   :  { %409 = vmatpush1.bf16.msra.mxu0 %v408_v11  ;;  %453 = vmatpush1.bf16.msra.mxu1 %v408_v11 }
  0x57   :  { %411 = vmatprep.subr.bf16.mxu0 %v410_v12  ;;  %438 = vmatprep.subr.bf16.mxu1 %v410_v12 }
  0x5a   :  { %413 = vmatpush1.bf16.msra.mxu0 %v412_v17  ;;  %454 = vmatpush1.bf16.msra.mxu1 %v412_v17 }
  0x5b   :  { %415 = vmatprep.subr.bf16.mxu0 %v414_v18  ;;  %439 = vmatprep.subr.bf16.mxu1 %v414_v18 }
  0x5e   :  { %417 = vmatpush1.bf16.msra.mxu0 %v416_v23  ;;  %455 = vmatpush1.bf16.msra.mxu1 %v416_v23 }
  0x5f   :  { %419 = vmatprep.subr.bf16.mxu0 %v418_v24  ;;  %440 = vmatprep.subr.bf16.mxu1 %v418_v24 }
  0x62   :  { %421 = vmatpush1.bf16.msra.mxu0 %v420_v29  ;;  %456 = vmatpush1.bf16.msra.mxu1 %v420_v29 }
  0x63   :  { %423 = vmatprep.subr.bf16.mxu0 %v422_v30  ;;  %441 = vmatprep.subr.bf16.mxu1 %v422_v30 }
  0x66   :  { %425 = vmatpush1.bf16.msra.mxu0 %v424_v33  ;;  %457 = vmatpush1.bf16.msra.mxu1 %v424_v33 }
  0x69   :  { %216 = vmatmul.mubr.f32.vlgmr.msra.gmra.mrb[0].mxu0 %v43_v34  ;;  %264 = vmatmul.mubr.f32.vlgmr.msra.gmra.mrb[0].mxu1 %v59_v35 }
  0x6a   :  { %221 = vmatprep.mubr.f32.mxu0 %v46_v36  ;;  %269 = vmatprep.mubr.f32.mxu1 %v62_v37 }
  0x6d   :  { %222 = vmatmul.mubr.f32.gmra.mrb[2].mxu0 %v45_v38  ;;  %270 = vmatmul.mubr.f32.gmra.mrb[2].mxu1 %v61_v39 }
  0x6e   :  { %227 = vmatprep.mubr.f32.mxu0 %v48_v40  ;;  %275 = vmatprep.mubr.f32.mxu1 %v64_v41 }
  0x71   :  { %228 = vmatmul.mubr.f32.gmra.mrb[4].mxu0 %v47_v42  ;;  %276 = vmatmul.mubr.f32.gmra.mrb[4].mxu1 %v63_v43 }
  0x72   :  { %233 = vmatprep.mubr.f32.mxu0 %v50_v44  ;;  %281 = vmatprep.mubr.f32.mxu1 %v66_v45 }
  0x75   :  { %234 = vmatmul.mubr.f32.gmra.mrb[6].mxu0 %v49_v46  ;;  %282 = vmatmul.mubr.f32.gmra.mrb[6].mxu1 %v65_v47 }
  0x76   :  { %239 = vmatprep.mubr.f32.mxu0 %v52_v48  ;;  %287 = vmatprep.mubr.f32.mxu1 %v68_v49 }
  0x79   :  { %240 = vmatmul.mubr.f32.gmra.mrb[8].mxu0 %v51_v50  ;;  %288 = vmatmul.mubr.f32.gmra.mrb[8].mxu1 %v67_v51 }
  0x7a   :  { %245 = vmatprep.mubr.f32.mxu0 %v54_v52  ;;  %293 = vmatprep.mubr.f32.mxu1 %v70_v53 }
  0x7d   :  { %246 = vmatmul.mubr.f32.gmra.mrb[10].mxu0 %v53_v54  ;;  %294 = vmatmul.mubr.f32.gmra.mrb[10].mxu1 %v69_v55 }
  0x7e   :  { %251 = vmatprep.mubr.f32.mxu0 %v56_v56  ;;  %299 = vmatprep.mubr.f32.mxu1 %v72_v57 }
  0x81   :  { %252 = vmatmul.mubr.f32.gmra.mrb[12].mxu0 %v55_v58  ;;  %300 = vmatmul.mubr.f32.gmra.mrb[12].mxu1 %v71_v59 }
  0x82   :  { %257 = vmatprep.mubr.f32.mxu0 %v58_v60  ;;  %305 = vmatprep.mubr.f32.mxu1 %v74_v61 }
  0x85   :  { %258 = vmatmul.mubr.f32.gmra.mrb[14].mxu0 %v57_v62  ;;  %306 = vmatmul.mubr.f32.gmra.mrb[14].mxu1 %v73_v63 }
 0x13c   :  { %v217_v7 = vpop.f32.mrb[0].mxu0  ;;  %v265_v8 = vpop.f32.mrb[0].mxu1 }
 0x13d   :  { %v218_v9 = vadd.f32 %v217_v7, %v593_v5  ;;  %v266_v10 = vadd.f32 %v265_v8, %v593_v5  ;;  %v219_v11 = vpop.f32.mrb[1].mxu0  ;;  %v267_v12 = vpop.f32.mrb[1].mxu1 }
 0x13e   :  { %v220_v13 = vadd.f32 %v219_v11, %v595_v6  ;;  %v268_v14 = vadd.f32 %v267_v12, %v595_v6 }
 0x13f   :  { %312 = vst [vmem:[#allocation7] sm:$0xff] %v218_v9  ;;  %328 = vst [vmem:[#allocation7 + $0x80] sm:$0xff] %v266_v10 }
 0x140   :  { %313 = vst [vmem:[#allocation7 + $0x8] sm:$0xff] %v220_v13  ;;  %329 = vst [vmem:[#allocation7 + $0x88] sm:$0xff] %v268_v14  ;;  %v223_v15 = vpop.f32.mrb[2].mxu0  ;;  %v271_v16 = vpop.f32.mrb[2].mxu1 }
 0x141   :  { %v224_v17 = vadd.f32 %v223_v15, %v593_v5  ;;  %v272_v18 = vadd.f32 %v271_v16, %v593_v5  ;;  %v225_v19 = vpop.f32.mrb[3].mxu0  ;;  %v273_v20 = vpop.f32.mrb[3].mxu1 }
 0x142   :  { %v226_v21 = vadd.f32 %v225_v19, %v595_v6  ;;  %v274_v22 = vadd.f32 %v273_v20, %v595_v6 }
 0x143   :  { %314 = vst [vmem:[#allocation7 + $0x10] sm:$0xff] %v224_v17  ;;  %330 = vst [vmem:[#allocation7 + $0x90] sm:$0xff] %v272_v18 }
 0x144   :  { %315 = vst [vmem:[#allocation7 + $0x18] sm:$0xff] %v226_v21  ;;  %331 = vst [vmem:[#allocation7 + $0x98] sm:$0xff] %v274_v22  ;;  %v229_v23 = vpop.f32.mrb[4].mxu0  ;;  %v277_v24 = vpop.f32.mrb[4].mxu1 }
 0x145   :  { %v230_v25 = vadd.f32 %v229_v23, %v593_v5  ;;  %v278_v26 = vadd.f32 %v277_v24, %v593_v5  ;;  %v231_v27 = vpop.f32.mrb[5].mxu0  ;;  %v279_v28 = vpop.f32.mrb[5].mxu1 }
 0x146   :  { %v232_v29 = vadd.f32 %v231_v27, %v595_v6  ;;  %v280_v30 = vadd.f32 %v279_v28, %v595_v6 }
 0x147   :  { %316 = vst [vmem:[#allocation7 + $0x20] sm:$0xff] %v230_v25  ;;  %332 = vst [vmem:[#allocation7 + $0xa0] sm:$0xff] %v278_v26 }
 0x148   :  { %317 = vst [vmem:[#allocation7 + $0x28] sm:$0xff] %v232_v29  ;;  %333 = vst [vmem:[#allocation7 + $0xa8] sm:$0xff] %v280_v30  ;;  %v235_v31 = vpop.f32.mrb[6].mxu0  ;;  %v283_v32 = vpop.f32.mrb[6].mxu1 }
 0x149   :  { %v236_v33 = vadd.f32 %v235_v31, %v593_v5  ;;  %v284_v34 = vadd.f32 %v283_v32, %v593_v5  ;;  %v237_v35 = vpop.f32.mrb[7].mxu0  ;;  %v285_v36 = vpop.f32.mrb[7].mxu1 }
 0x14a   :  { %v238_v37 = vadd.f32 %v237_v35, %v595_v6  ;;  %v286_v38 = vadd.f32 %v285_v36, %v595_v6 }
 0x14b   :  { %318 = vst [vmem:[#allocation7 + $0x30] sm:$0xff] %v236_v33  ;;  %334 = vst [vmem:[#allocation7 + $0xb0] sm:$0xff] %v284_v34 }
 0x14c   :  { %319 = vst [vmem:[#allocation7 + $0x38] sm:$0xff] %v238_v37  ;;  %335 = vst [vmem:[#allocation7 + $0xb8] sm:$0xff] %v286_v38  ;;  %v241_v39 = vpop.f32.mrb[8].mxu0  ;;  %v289_v40 = vpop.f32.mrb[8].mxu1 }
 0x14d   :  { %v242_v41 = vadd.f32 %v241_v39, %v593_v5  ;;  %v290_v42 = vadd.f32 %v289_v40, %v593_v5  ;;  %v243_v43 = vpop.f32.mrb[9].mxu0  ;;  %v291_v44 = vpop.f32.mrb[9].mxu1 }
 0x14e   :  { %v244_v45 = vadd.f32 %v243_v43, %v595_v6  ;;  %v292_v46 = vadd.f32 %v291_v44, %v595_v6 }
 0x14f   :  { %320 = vst [vmem:[#allocation7 + $0x40] sm:$0xff] %v242_v41  ;;  %336 = vst [vmem:[#allocation7 + $0xc0] sm:$0xff] %v290_v42 }
 0x150   :  { %321 = vst [vmem:[#allocation7 + $0x48] sm:$0xff] %v244_v45  ;;  %337 = vst [vmem:[#allocation7 + $0xc8] sm:$0xff] %v292_v46  ;;  %v247_v47 = vpop.f32.mrb[10].mxu0  ;;  %v295_v48 = vpop.f32.mrb[10].mxu1 }
 0x151   :  { %v248_v49 = vadd.f32 %v247_v47, %v593_v5  ;;  %v296_v50 = vadd.f32 %v295_v48, %v593_v5  ;;  %v249_v51 = vpop.f32.mrb[11].mxu0  ;;  %v297_v52 = vpop.f32.mrb[11].mxu1 }
 0x152   :  { %v250_v53 = vadd.f32 %v249_v51, %v595_v6  ;;  %v298_v54 = vadd.f32 %v297_v52, %v595_v6 }
 0x153   :  { %322 = vst [vmem:[#allocation7 + $0x50] sm:$0xff] %v248_v49  ;;  %338 = vst [vmem:[#allocation7 + $0xd0] sm:$0xff] %v296_v50 }
 0x154   :  { %323 = vst [vmem:[#allocation7 + $0x58] sm:$0xff] %v250_v53  ;;  %339 = vst [vmem:[#allocation7 + $0xd8] sm:$0xff] %v298_v54  ;;  %v253_v55 = vpop.f32.mrb[12].mxu0  ;;  %v301_v56 = vpop.f32.mrb[12].mxu1 }
 0x155   :  { %v254_v57 = vadd.f32 %v253_v55, %v593_v5  ;;  %v302_v58 = vadd.f32 %v301_v56, %v593_v5  ;;  %v255_v59 = vpop.f32.mrb[13].mxu0  ;;  %v303_v60 = vpop.f32.mrb[13].mxu1 }
 0x156   :  { %v256_v61 = vadd.f32 %v255_v59, %v595_v6  ;;  %v304_v62 = vadd.f32 %v303_v60, %v595_v6 }
 0x157   :  { %324 = vst [vmem:[#allocation7 + $0x60] sm:$0xff] %v254_v57  ;;  %340 = vst [vmem:[#allocation7 + $0xe0] sm:$0xff] %v302_v58 }
 0x158   :  { %325 = vst [vmem:[#allocation7 + $0x68] sm:$0xff] %v256_v61  ;;  %341 = vst [vmem:[#allocation7 + $0xe8] sm:$0xff] %v304_v62  ;;  %v259_v63 = vpop.f32.mrb[14].mxu0  ;;  %v307_v0 = vpop.f32.mrb[14].mxu1 }
 0x159   :  { %v260_v1 = vadd.f32 %v259_v63, %v593_v5  ;;  %v308_v2 = vadd.f32 %v307_v0, %v593_v5  ;;  %v261_v3 = vpop.f32.mrb[15].mxu0  ;;  %v309_v4 = vpop.f32.mrb[15].mxu1 }
 0x15a   :  { %v262_v7 = vadd.f32 %v261_v3, %v595_v6  ;;  %v310_v8 = vadd.f32 %v309_v4, %v595_v6 }
 0x15b   :  { %326 = vst [vmem:[#allocation7 + $0x70] sm:$0xff] %v260_v1  ;;  %342 = vst [vmem:[#allocation7 + $0xf0] sm:$0xff] %v308_v2 }
 0x15c   :  { %327 = vst [vmem:[#allocation7 + $0x78] sm:$0xff] %v262_v7  ;;  %343 = vst [vmem:[#allocation7 + $0xf8] sm:$0xff] %v310_v8 }
 0x15d   :  { %518 = shalt.err (!%p515_p6)
}
 0x15e   :  { %s519_s15 = scalar_lea.hbm %s647_s3, 4096 }
 0x15f   :  { %p520_p7 = scmp.ne.s32.totalorder %s647_s3, %s519_s15  ;;  %p523_p8 = scmp.lt.u32.totalorder %s519_s15, %s647_s3 }
 0x161   :  { %p525_p9 = pnand %p523_p8, %p520_p7 }
 0x163   :  { %528 = shalt.err (!%p525_p9)
}
 0x164   :  { %355 = dma.vmem_to_hbm [thread:$0]  %s350_s11, 4096, %s647_s3, [#allocation4], %s536_s22, %s536_s22, %s537_s23  }
 0x165   :  { %533 = dma.done.wait [#allocation4], 4096  }
 0x166   :  { %534 = vsyncadd [#allocation4], 4294963200 }
 0x167   :  { %359 = vsyncpa [#allocation3], 1 }
 0x168   :  { %360 = vsyncpa [#allocation6], 1 }
 0x169   :  { %361 = vsyncpa [#allocation4], 1 }

</bundles_post_ra>
